<compile_context>
chip_gen: v7x
topology: tpu7x:2x2x1
jax: 0.10.0
libtpu: 0.0.40
codegen_flags: <defaults>
</compile_context>

<pallas_src>
import functools

import jax
import jax.numpy as jnp
from jax.experimental import pallas as pl
from jax.experimental.pallas import tpu as pltpu


def _round_up(x, m):
    return (x + m - 1) // m * m


def br_kernel(x_ref, w_ref, b_ref, o_ref):
    k = pl.program_id(2)

    @pl.when(k == 0)
    def _():
        # Fold the bias into the accumulator init (one broadcast per output
        # tile instead of a (tm, tn) VPU add in the epilogue).
        o_ref[...] = jnp.broadcast_to(b_ref[...], o_ref.shape)

    # Accumulate directly into the f32 output tile (resident across the K
    # axis because the output block index is independent of k).
    o_ref[...] += jnp.dot(
        x_ref[...], w_ref[...], preferred_element_type=jnp.float32
    )

    @pl.when(k == pl.num_programs(2) - 1)
    def _():
        # sigmoid(z) = 0.5 * tanh(0.5 * z) + 0.5 : a single EUP transcendental
        # per element, numerically safe for large |z|.
        o_ref[...] = 0.5 * jnp.tanh(0.5 * o_ref[...]) + 0.5


def _pick_tiles(B, D_in, D_out, sub, bpe, tm, tn, tk):
    """Default tile heuristic; honors user-provided values."""
    if B <= 64:
        # Tiny M -> weight-bandwidth bound: wide N tile, deep K tile so the
        # weight panel is streamed through HBM as few times as possible.
        tm_d = _round_up(B, sub)
        tn_d = min(_round_up(D_out, 128), 1024)
        tk_d = min(_round_up(D_in, 128), 2048 if bpe == 2 else 1024)
    else:
        tm_d = 512
        tn_d = 512
        tk_d = 1024 if bpe == 2 else 512
    tm = tm if tm is not None else tm_d
    tn = tn if tn is not None else tn_d
    tk = tk if tk is not None else tk_d

    # Clamp to (padded) problem size and enforce hardware alignment:
    #   sublanes: 16 for 2-byte operands, 8 for f32; lanes: 128.
    tm = max(sub, min(_round_up(tm, sub), _round_up(B, sub)))
    tn = max(128, min(_round_up(tn, 128), _round_up(D_out, 128)))
    tk = max(128, min(_round_up(tk, 128), _round_up(D_in, 128)))
    return tm, tn, tk


def br_forward(x, w_t, b, *, compute_dtype=jnp.bfloat16, tm=None, tn=None, tk=None):
    """x: (B, D_in); w_t: (D_in, D_out); b: (D_out,) -> (B, D_out) f32."""
    B, D_in = x.shape
    D_out = w_t.shape[1]

    bpe = jnp.dtype(compute_dtype).itemsize
    sub = 16 if bpe == 2 else 8
    tm, tn, tk = _pick_tiles(B, D_in, D_out, sub, bpe, tm, tn, tk)

    Bp = _round_up(B, tm)
    Kp = _round_up(D_in, tk)
    Np = _round_up(D_out, tn)

    # Cast (no-op if already in compute dtype); pad ONLY if ragged.  Zero
    # padding of K is required for correctness (padded K contributes 0).
    xc = x.astype(compute_dtype)
    wc = w_t.astype(compute_dtype)
    if (Bp, Kp) != (B, D_in):
        xc = jnp.pad(xc, ((0, Bp - B), (0, Kp - D_in)))
    if (Kp, Np) != (D_in, D_out):
        wc = jnp.pad(wc, ((0, Kp - D_in), (0, Np - D_out)))
    bc = b.astype(jnp.float32).reshape(1, D_out)
    if Np != D_out:
        bc = jnp.pad(bc, ((0, 0), (0, Np - D_out)))

    grid = (Bp // tm, Np // tn, Kp // tk)

    # VMEM budget: double-buffered X/W tiles + double-buffered f32 output tile
    # + bias row.  Only raise the scoped-VMEM limit when we actually need it
    # (keeps v5e's 16 MiB / v7x's 64 MiB-physical budgets safe).
    vmem_bytes = 2 * (tm * tk + tk * tn) * bpe + 2 * (tm * tn + tn) * 4
    cp_kwargs = dict(dimension_semantics=("parallel", "parallel", "arbitrary"))
    if vmem_bytes > 12 * 1024 * 1024:
        cp_kwargs["vmem_limit_bytes"] = int(vmem_bytes) + (4 << 20)

    cost = pl.CostEstimate(
        flops=2 * Bp * Kp * Np,
        transcendentals=Bp * Np,
        bytes_accessed=(Bp * Kp + Kp * Np) * bpe + (Np + Bp * Np) * 4,
    )

    out = pl.pallas_call(
        br_kernel,
        out_shape=jax.ShapeDtypeStruct((Bp, Np), jnp.float32),
        grid_spec=pltpu.PrefetchScalarGridSpec(
            num_scalar_prefetch=0,
            grid=grid,
            in_specs=[
                pl.BlockSpec((tm, tk), lambda i, j, k: (i, k)),
                pl.BlockSpec((tk, tn), lambda i, j, k: (k, j)),
                pl.BlockSpec((1, tn), lambda i, j, k: (0, j)),
            ],
            out_specs=pl.BlockSpec((tm, tn), lambda i, j, k: (i, j)),
        ),
        compiler_params=pltpu.CompilerParams(**cp_kwargs),
        cost_estimate=cost,
    )(xc, wc, bc)

    if (Bp, Np) != (B, D_out):
        out = out[:B, :D_out]
    return out


if __name__ == "__main__":
    key = jax.random.PRNGKey(0)
    k_x, k_w, k_b, k_x2, k_w2, k_b2, k_x3, k_w3, k_b3 = jax.random.split(key, 9)

    fwd = jax.jit(
        br_forward, static_argnames=("compute_dtype", "tm", "tn", "tk")
    )

    # --- 1. Toy shape matching the original module config -------------------
    batch, input_size, output_size = 8, 32, 16
    w = jax.random.uniform(
        k_w, (output_size, input_size), minval=-0.1, maxval=0.1, dtype=jnp.float32
    )
    b = jax.random.uniform(
        k_b, (output_size,), minval=-0.1, maxval=0.1, dtype=jnp.float32
    )
    x = jax.random.normal(k_x, (batch, input_size), dtype=jnp.float32)
    ref = jax.nn.sigmoid(x @ w.T + b)

    out_bf16 = jax.block_until_ready(fwd(x, w.T, b))                  # bf16 default
    out_f32 = jax.block_until_ready(fwd(x, w.T, b, compute_dtype=jnp.float32))
    assert out_bf16.shape == (batch, output_size)
    assert jnp.allclose(out_bf16, ref, atol=2e-2, rtol=2e-2)
    assert jnp.allclose(out_f32, ref, atol=2e-3, rtol=2e-3)

    # --- 2. Larger aligned shape: exercises the full (M, N, K) tiling -------
    B2, D_in2, D_out2 = 1024, 2048, 1024                               # grid (2,2,2)
    w2 = jax.random.uniform(
        k_w2, (D_out2, D_in2), minval=-0.05, maxval=0.05, dtype=jnp.float32
    )
    b2 = jax.random.uniform(k_b2, (D_out2,), minval=-0.1, maxval=0.1, dtype=jnp.float32)
    x2 = jax.random.normal(k_x2, (B2, D_in2), dtype=jnp.float32)
    ref2 = jax.nn.sigmoid(x2 @ w2.T + b2)

    out2 = jax.block_until_ready(fwd(x2, w2.T, b2))                    # bf16 default
    assert out2.shape == (B2, D_out2)
    assert jnp.allclose(out2, ref2, atol=2e-2, rtol=2e-2)

    # --- 3. Ragged shape (f32 path): exercises the padding branch -----------
    B3, D_in3, D_out3 = 100, 300, 200
    w3 = jax.random.uniform(
        k_w3, (D_out3, D_in3), minval=-0.05, maxval=0.05, dtype=jnp.float32
    )
    b3 = jax.random.uniform(k_b3, (D_out3,), minval=-0.1, maxval=0.1, dtype=jnp.float32)
    x3 = jax.random.normal(k_x3, (B3, D_in3), dtype=jnp.float32)
    ref3 = jax.nn.sigmoid(x3 @ w3.T + b3)

    out3 = jax.block_until_ready(fwd(x3, w3.T, b3, compute_dtype=jnp.float32))
    assert out3.shape == (B3, D_out3)
    assert jnp.allclose(out3, ref3, atol=2e-3, rtol=2e-3)

    print("KERNEL_OK")
</pallas_src>

<mosaic_0001>
module attributes {stable_mosaic.version = 11 : i64} {
  func.func @br_kernel(%arg0: i32, %arg1: i32, %arg2: i32, %arg3: memref<16x128xbf16, #tpu.memory_space<vmem>>, %arg4: memref<128x128xbf16, #tpu.memory_space<vmem>>, %arg5: memref<1x128xf32, #tpu.memory_space<vmem>>, %arg6: memref<16x128xf32, #tpu.memory_space<vmem>>) attributes {dimension_semantics = [#tpu.dimension_semantics<parallel>, #tpu.dimension_semantics<parallel>, #tpu.dimension_semantics<arbitrary>], iteration_bounds = array<i64: 1, 1, 1>, scalar_prefetch = 0 : i64, scratch_operands = 0 : i64, tpu.core_type = #tpu.core_type<tc>, window_params = [{transform_indices = @transform_0, window_bounds = array<i64: 16, 128>}, {transform_indices = @transform_1, window_bounds = array<i64: 128, 128>}, {transform_indices = @transform_2, window_bounds = array<i64: 1, 128>}, {transform_indices = @transform_3, window_bounds = array<i64: 16, 128>}]} {
    %c0_i32 = arith.constant 0 : i32
    %0 = arith.cmpi eq, %arg2, %c0_i32 : i32
    %1 = arith.extui %0 : i1 to i32
    %c0_i32_0 = arith.constant 0 : i32
    %2 = arith.cmpi ne, %1, %c0_i32_0 : i32
    scf.if %2 {
      %c0_10 = arith.constant 0 : index
      %c0_11 = arith.constant 0 : index
      %12 = vector.load %arg5[%c0_10, %c0_11] : memref<1x128xf32, #tpu.memory_space<vmem>>, vector<1x128xf32>
      %13 = vector.shape_cast %12 : vector<1x128xf32> to vector<1x128xf32>
      %14 = vector.broadcast %13 : vector<1x128xf32> to vector<16x128xf32>
      %c0_12 = arith.constant 0 : index
      %c0_13 = arith.constant 0 : index
      %15 = vector.load %arg6[%c0_12, %c0_13] : memref<16x128xf32, #tpu.memory_space<vmem>>, vector<16x128xf32>
      tpu.vector_store %arg6[%c0_12, %c0_13], %14 {strides = array<i32>} : memref<16x128xf32, #tpu.memory_space<vmem>>, vector<16x128xf32>,
    } else {
    }
    %c0 = arith.constant 0 : index
    %c0_1 = arith.constant 0 : index
    %3 = vector.load %arg6[%c0, %c0_1] : memref<16x128xf32, #tpu.memory_space<vmem>>, vector<16x128xf32>
    %c0_2 = arith.constant 0 : index
    %c0_3 = arith.constant 0 : index
    %4 = vector.load %arg3[%c0_2, %c0_3] : memref<16x128xbf16, #tpu.memory_space<vmem>>, vector<16x128xbf16>
    %c0_4 = arith.constant 0 : index
    %c0_5 = arith.constant 0 : index
    %5 = vector.load %arg4[%c0_4, %c0_5] : memref<128x128xbf16, #tpu.memory_space<vmem>>, vector<128x128xbf16>
    %cst = arith.constant dense<0.000000e+00> : vector<16x128xf32>
    %6 = tpu.matmul %4, %5, %cst {dimension_numbers = #tpu.dot_dimension_numbers<[1], [0], [0], [1], [0, 0, 1, 1], [], []>} : vector<16x128xbf16>, vector<128x128xbf16>, vector<16x128xf32> -> vector<16x128xf32>
    %7 = arith.addf %3, %6 : vector<16x128xf32>
    %c0_6 = arith.constant 0 : index
    %c0_7 = arith.constant 0 : index
    %8 = vector.load %arg6[%c0_6, %c0_7] : memref<16x128xf32, #tpu.memory_space<vmem>>, vector<16x128xf32>
    tpu.vector_store %arg6[%c0_6, %c0_7], %7 {strides = array<i32>} : memref<16x128xf32, #tpu.memory_space<vmem>>, vector<16x128xf32>,
    %c0_i32_8 = arith.constant 0 : i32
    %9 = arith.cmpi eq, %arg2, %c0_i32_8 : i32
    %10 = arith.extui %9 : i1 to i32
    %c0_i32_9 = arith.constant 0 : i32
    %11 = arith.cmpi ne, %10, %c0_i32_9 : i32
    scf.if %11 {
      %c0_10 = arith.constant 0 : index
      %c0_11 = arith.constant 0 : index
      %12 = vector.load %arg6[%c0_10, %c0_11] : memref<16x128xf32, #tpu.memory_space<vmem>>, vector<16x128xf32>
      %cst_12 = arith.constant 5.000000e-01 : f32
      %13 = vector.broadcast %cst_12 : f32 to vector<16x128xf32>
      %14 = arith.mulf %13, %12 : vector<16x128xf32>
      %15 = math.tanh %14 : vector<16x128xf32>
      %cst_13 = arith.constant 5.000000e-01 : f32
      %16 = vector.broadcast %cst_13 : f32 to vector<16x128xf32>
      %17 = arith.mulf %16, %15 : vector<16x128xf32>
      %cst_14 = arith.constant 5.000000e-01 : f32
      %18 = vector.broadcast %cst_14 : f32 to vector<16x128xf32>
      %19 = arith.addf %17, %18 : vector<16x128xf32>
      %c0_15 = arith.constant 0 : index
      %c0_16 = arith.constant 0 : index
      %20 = vector.load %arg6[%c0_15, %c0_16] : memref<16x128xf32, #tpu.memory_space<vmem>>, vector<16x128xf32>
      tpu.vector_store %arg6[%c0_15, %c0_16], %19 {strides = array<i32>} : memref<16x128xf32, #tpu.memory_space<vmem>>, vector<16x128xf32>,
    } else {
    }
    return
  }
  func.func @transform_0(%arg0: i32, %arg1: i32, %arg2: i32) -> (i32, i32) {
    %c0_i32 = arith.constant 0 : i32
    return %arg0, %arg2 : i32, i32
  }
  func.func @transform_1(%arg0: i32, %arg1: i32, %arg2: i32) -> (i32, i32) {
    %c0_i32 = arith.constant 0 : i32
    return %arg2, %arg1 : i32, i32
  }
  func.func @transform_2(%arg0: i32, %arg1: i32, %arg2: i32) -> (i32, i32) {
    %c0_i32 = arith.constant 0 : i32
    %c0_i32_0 = arith.constant 0 : i32
    return %c0_i32, %arg1 : i32, i32
  }
  func.func @transform_3(%arg0: i32, %arg1: i32, %arg2: i32) -> (i32, i32) {
    %c0_i32 = arith.constant 0 : i32
    return %arg0, %arg1 : i32, i32
  }
}

</mosaic_0001>

<bundles_post_ra>
// kernel: br_forward.1
= control target key start
LH: loop header
LB: loop body
LE: loop exit
PB: predicated region body
PF: predicated region fallthrough
CT: control target
= control target key end

     0   :  { %v220_v0 = vmov 0.0   ;;  %vm221_vm0 = vmmov 0   ;;  %s278_s1 = inlined_call_operand.vmem [shape: bf16[128,128], index: 1, kind: input, shape index: {}]   ;;  %s279_s0 = inlined_call_operand.vmem [shape: bf16[16,128], index: 0, kind: input, shape index: {}]   ;;  %s280_s2 = inlined_call_operand.vmem [shape: f32[1,128], index: 2, kind: input, shape index: {}]   ;;  %s281_s3 = inlined_call_operand.vmem [shape: f32[16,128], index: 3, kind: output, shape index: {}]  }
   0x1   :  { %185 = vmatprep.subr.bf16.mxu0 %v220_v0  ;;  %v207_v1 = vld [vmem:[%s278_s1] sm:$0xff]   ;;  %201 = vmatprep.mubr.msk.bf16.mxu0 %vm221_vm0, %v220_v0  ;;  %v208_v2 = vld [vmem:[%s278_s1 + $0x8] sm:$0xff]   ;;  %v209_v3 = vld [vmem:[%s278_s1 + $0x10] sm:$0xff]  }
   0x2   :  { %186 = vmatpush3.bf16.msra.mxu0 %v207_v1  ;;  %v210_v4 = vld [vmem:[%s278_s1 + $0x18] sm:$0xff]   ;;  %v211_v5 = vld [vmem:[%s278_s1 + $0x20] sm:$0xff]   ;;  %v212_v6 = vld [vmem:[%s278_s1 + $0x28] sm:$0xff]  }
   0x3   :  { %187 = vmatprep.subr.bf16.mxu0 %v220_v0  ;;  %v213_v7 = vld [vmem:[%s278_s1 + $0x30] sm:$0xff]   ;;  %v214_v8 = vld [vmem:[%s278_s1 + $0x38] sm:$0xff]   ;;  %v215_v9 = vld [vmem:[%s279_s0] sm:$0xff]  }
   0x4   :  { %v166_v10 = vld [vmem:[%s280_s2] ss:$0 sm:$0xff] }
   0x6   :  { %188 = vmatpush3.bf16.msra.mxu0 %v208_v2 }
   0x7   :  { %189 = vmatprep.subr.bf16.mxu0 %v220_v0 }
   0xa   :  { %190 = vmatpush3.bf16.msra.mxu0 %v209_v3 }
   0xb   :  { %191 = vmatprep.subr.bf16.mxu0 %v220_v0 }
   0xe   :  { %192 = vmatpush3.bf16.msra.mxu0 %v210_v4 }
   0xf   :  { %193 = vmatprep.subr.bf16.mxu0 %v220_v0 }
  0x12   :  { %194 = vmatpush3.bf16.msra.mxu0 %v211_v5 }
  0x13   :  { %195 = vmatprep.subr.bf16.mxu0 %v220_v0 }
  0x16   :  { %196 = vmatpush3.bf16.msra.mxu0 %v212_v6 }
  0x17   :  { %197 = vmatprep.subr.bf16.mxu0 %v220_v0 }
  0x1a   :  { %198 = vmatpush3.bf16.msra.mxu0 %v213_v7 }
  0x1b   :  { %199 = vmatprep.subr.bf16.mxu0 %v220_v0 }
  0x1e   :  { %200 = vmatpush3.bf16.msra.mxu0 %v214_v8 }
  0x21   :  { %202 = vmatmul.mubr.bf16.vlgmr.msra.gmra.mrb[0].mxu0 %v215_v9 }
  0xf4   :  { %v136_v11 = vpop.f32.mrb[0].mxu0 }
  0xf5   :  { %v143_v12 = vadd.f32 %v166_v10, %v136_v11  ;;  %v203_v13 = vpop.f32.mrb[1].mxu0 }
  0xf6   :  { %v139_v14 = vpop.f32.mrb[2].mxu0 }
  0xf7   :  { %v152_v15 = vmul.f32 0.5, %v143_v12  ;;  %v144_v16 = vadd.f32 %v166_v10, %v139_v14  ;;  %v204_v17 = vpop.f32.mrb[3].mxu0 }
  0xf9   :  { %216 = vtanh.f32 %v152_v15  ;;  %v153_v18 = vmul.f32 0.5, %v144_v16 }
  0xfb   :  { %218 = vtanh.f32 %v153_v18 }
 0x103   :  { %v217_v19 = vpop.eup %216 }
 0x104   :  { %v156_v20 = vmul.f32 0.5, %v217_v19 }
 0x105   :  { %v219_v21 = vpop.eup %218 }
 0x106   :  { %v158_v22 = vadd.f32 0.5, %v156_v20  ;;  %v157_v23 = vmul.f32 0.5, %v219_v21 }
 0x108   :  { %160 = vst [vmem:[%s281_s3] sm:$0xff] %v158_v22  ;;  %v159_v24 = vadd.f32 0.5, %v157_v23 }
 0x10a   :  { %161 = vst [vmem:[%s281_s3 + $0x8] sm:$0xff] %v159_v24 }

</bundles_post_ra>
